<compile_context>
chip_gen: v7x
topology: tpu7x:2x2x1
jax: 0.10.0
libtpu: 0.0.40
codegen_flags: <defaults>
</compile_context>

<pallas_src>
import jax
import jax.numpy as jnp
from jax import lax
from jax.experimental import pallas as pl
from jax.experimental.pallas import tpu as pltpu

INPUT_SIZE = 1
HIDDEN_SIZE = 64      # H, matches the PyTorch module
HP = 128              # padded gate/state width: one full 128-lane vreg each
OUTPUT_SIZE = 1


def lstm_kernel(seq_ref, w_ih_ref, bias_ref, w_hh_ref, w_lin_ref, b_lin_ref,
                out_ref):
    """Full LSTM recurrence (unrolled) + final Linear, all in one kernel.

    seq_ref  : (S,)        f32 in SMEM (scalar reads per step)
    w_ih_ref : (1, 4*HP)   input weights, gate order [i|f|o|g], zero-padded
    bias_ref : (1, 4*HP)   b_ih + b_hh, same layout
    w_hh_ref : (H, 4*HP)   recurrent weights at real contraction depth (H=64)
    w_lin_ref: (1, HP)     final linear weights, zero-padded to 128 lanes
    b_lin_ref: (1, 1)
    out_ref  : (1, OUTPUT_SIZE)   == pred[-1]
    """
    S = seq_ref.shape[0]
    H = HIDDEN_SIZE

    w_ih_row = w_ih_ref[...]          # (1, 4*HP) -- 4 vregs, cheap to keep live
    bias_row = bias_ref[...]          # (1, 4*HP)

    h = jnp.zeros((1, HP), jnp.float32)
    c = jnp.zeros((1, HP), jnp.float32)

    # S is tiny & static -> fully unroll the serial dependency chain so the
    # LLO scheduler sees it end to end.
    for t in range(S):
        x_t = seq_ref[t]                                   # scalar (SMEM sld)
        gates = (x_t * w_ih_row + bias_row
                 + jnp.dot(h[:, :H], w_hh_ref[...],        # (1,64)x(64,4*HP)
                           preferred_element_type=jnp.float32))
        sig = jax.nn.sigmoid(gates[:, :3 * HP])            # [i|f|o] in one shot
        g = jnp.tanh(gates[:, 3 * HP:])                    # tanh gate
        i = sig[:, 0 * HP:1 * HP]
        f = sig[:, 1 * HP:2 * HP]
        o = sig[:, 2 * HP:3 * HP]
        c = f * c + i * g
        h = o * jnp.tanh(c)

    # Final Linear on VPU (mul) + XLU (lane reduce); keeps the MXU out of it.
    out_ref[...] = (jnp.sum(h * w_lin_ref[...], axis=-1, keepdims=True)
                    + b_lin_ref[...])


def _pack_gate_axis(x, h=HIDDEN_SIZE, hp=HP):
    """(..., 4*h) in PyTorch gate order [i,f,g,o] -> (..., 4*hp) in kernel
    order [i,f,o,g], each gate zero-padded from h to hp lanes."""
    i, f, g, o = jnp.split(x, 4, axis=-1)
    pad = [(0, 0)] * (x.ndim - 1) + [(0, hp - h)]
    return jnp.concatenate(
        [jnp.pad(i, pad), jnp.pad(f, pad), jnp.pad(o, pad), jnp.pad(g, pad)],
        axis=-1)


def pack_params(params):
    """One-time (model-load) packing into the kernel layout.
    NOT part of the per-call hot path."""
    w_ih, w_hh, b_ih, b_hh, w_lin, b_lin = params
    H = HIDDEN_SIZE
    w_ih_row = _pack_gate_axis(w_ih.T.astype(jnp.float32))                  # (1, 4*HP)
    bias_row = _pack_gate_axis((b_ih + b_hh)[None, :].astype(jnp.float32))  # (1, 4*HP)
    w_hh_r = _pack_gate_axis(w_hh.T.astype(jnp.float32))                    # (H, 4*HP) - real depth
    w_lin_row = jnp.pad(w_lin.astype(jnp.float32), ((0, 0), (0, HP - H)))   # (1, HP)
    b_lin_r = b_lin[None, :].astype(jnp.float32)                            # (1, 1)
    return (w_ih_row, bias_row, w_hh_r, w_lin_row, b_lin_r)


@jax.jit
def lstm_forward(seq, packed):
    """seq: f32[S]. packed: output of pack_params. Returns f32[OUTPUT_SIZE]
    (PyTorch pred[-1], zero initial hidden/cell state)."""
    w_ih_row, bias_row, w_hh_r, w_lin_row, b_lin_r = packed
    seq = seq.astype(jnp.float32)

    vmem = pl.BlockSpec(memory_space=pltpu.MemorySpace.VMEM)
    smem = pl.BlockSpec(memory_space=pltpu.MemorySpace.SMEM)
    out = pl.pallas_call(
        lstm_kernel,
        out_shape=jax.ShapeDtypeStruct((1, OUTPUT_SIZE), jnp.float32),
        in_specs=[smem, vmem, vmem, vmem, vmem, vmem],
        out_specs=vmem,
    )(seq, w_ih_row, bias_row, w_hh_r, w_lin_row, b_lin_r)
    return out[0]                                           # (output_size,)


def lstm_reference(seq, params):
    """Pure-JAX reference matching torch.nn.LSTM + Linear semantics."""
    w_ih, w_hh, b_ih, b_hh, w_lin, b_lin = params
    H = HIDDEN_SIZE
    h = jnp.zeros((H,), jnp.float32)
    c = jnp.zeros((H,), jnp.float32)

    def step(carry, x_t):
        h, c = carry
        gates = w_ih[:, 0] * x_t + w_hh @ h + b_ih + b_hh   # (4H,) [i,f,g,o]
        i = jax.nn.sigmoid(gates[0 * H:1 * H])
        f = jax.nn.sigmoid(gates[1 * H:2 * H])
        g = jnp.tanh(gates[2 * H:3 * H])
        o = jax.nn.sigmoid(gates[3 * H:4 * H])
        c_new = f * c + i * g
        h_new = o * jnp.tanh(c_new)
        return (h_new, c_new), None

    (h, c), _ = lax.scan(step, (h, c), seq.astype(jnp.float32))
    return w_lin @ h + b_lin                                 # (output_size,)


def init_params(key):
    """Deterministic init mimicking PyTorch's U(-1/sqrt(H), 1/sqrt(H))."""
    H = HIDDEN_SIZE
    k = 1.0 / jnp.sqrt(jnp.float32(H))
    keys = jax.random.split(key, 6)
    w_ih = jax.random.uniform(keys[0], (4 * H, INPUT_SIZE), jnp.float32, -k, k)
    w_hh = jax.random.uniform(keys[1], (4 * H, H), jnp.float32, -k, k)
    b_ih = jax.random.uniform(keys[2], (4 * H,), jnp.float32, -k, k)
    b_hh = jax.random.uniform(keys[3], (4 * H,), jnp.float32, -k, k)
    w_lin = jax.random.uniform(keys[4], (OUTPUT_SIZE, H), jnp.float32, -k, k)
    b_lin = jax.random.uniform(keys[5], (OUTPUT_SIZE,), jnp.float32, -k, k)
    return (w_ih, w_hh, b_ih, b_hh, w_lin, b_lin)


if __name__ == "__main__":
    key = jax.random.PRNGKey(0)
    pkey, skey = jax.random.split(key)
    params = init_params(pkey)
    packed = jax.block_until_ready(pack_params(params))   # one-time model-load cost

    SEQ_LEN = 8
    seq = jax.random.normal(skey, (SEQ_LEN,), jnp.float32)

    pred = jax.block_until_ready(lstm_forward(seq, packed))
    ref = jax.block_until_ready(lstm_reference(seq, params))

    assert pred.shape == (OUTPUT_SIZE,)
    assert jnp.allclose(pred, ref, atol=1e-5, rtol=1e-5), (pred, ref)
    print("KERNEL_OK")
</pallas_src>

<mosaic_0001>
module attributes {stable_mosaic.version = 11 : i64} {
  func.func @lstm_kernel(%arg0: memref<8xf32, #tpu.memory_space<smem>>, %arg1: memref<1x512xf32, #tpu.memory_space<vmem>>, %arg2: memref<1x512xf32, #tpu.memory_space<vmem>>, %arg3: memref<64x512xf32, #tpu.memory_space<vmem>>, %arg4: memref<1x128xf32, #tpu.memory_space<vmem>>, %arg5: memref<1x1xf32, #tpu.memory_space<vmem>>, %arg6: memref<1x1xf32, #tpu.memory_space<vmem>>) attributes {dimension_semantics = [], scalar_prefetch = 0 : i64, scratch_operands = 0 : i64, tpu.core_type = #tpu.core_type<tc>} {
    %c0 = arith.constant 0 : index
    %c0_0 = arith.constant 0 : index
    %0 = vector.load %arg1[%c0, %c0_0] : memref<1x512xf32, #tpu.memory_space<vmem>>, vector<1x512xf32>
    %c0_1 = arith.constant 0 : index
    %c0_2 = arith.constant 0 : index
    %1 = vector.load %arg2[%c0_1, %c0_2] : memref<1x512xf32, #tpu.memory_space<vmem>>, vector<1x512xf32>
    %cst = arith.constant 0.000000e+00 : f32
    %2 = vector.broadcast %cst : f32 to vector<1x128xf32>
    %cst_3 = arith.constant 0.000000e+00 : f32
    %3 = vector.broadcast %cst_3 : f32 to vector<1x128xf32>
    %c0_4 = arith.constant 0 : index
    %4 = memref.load %arg0[%c0_4] : memref<8xf32, #tpu.memory_space<smem>>
    %5 = vector.broadcast %4 : f32 to vector<1x512xf32>
    %6 = arith.mulf %5, %0 : vector<1x512xf32>
    %7 = arith.addf %6, %1 : vector<1x512xf32>
    %8 = vector.extract_strided_slice %2 {offsets = [0, 0], sizes = [1, 64], strides = [1, 1]} : vector<1x128xf32> to vector<1x64xf32>
    %c0_5 = arith.constant 0 : index
    %c0_6 = arith.constant 0 : index
    %9 = vector.load %arg3[%c0_5, %c0_6] : memref<64x512xf32, #tpu.memory_space<vmem>>, vector<64x512xf32>
    %cst_7 = arith.constant dense<0.000000e+00> : vector<1x512xf32>
    %10 = tpu.matmul %8, %9, %cst_7 {dimension_numbers = #tpu.dot_dimension_numbers<[1], [0], [0], [1], [0, 0, 1, 1], [], []>} : vector<1x64xf32>, vector<64x512xf32>, vector<1x512xf32> -> vector<1x512xf32>
    %11 = arith.addf %7, %10 : vector<1x512xf32>
    %12 = vector.extract_strided_slice %11 {offsets = [0, 0], sizes = [1, 384], strides = [1, 1]} : vector<1x512xf32> to vector<1x384xf32>
    %13 = arith.negf %12 : vector<1x384xf32>
    %14 = math.exp %13 : vector<1x384xf32>
    %cst_8 = arith.constant 1.000000e+00 : f32
    %15 = vector.broadcast %cst_8 : f32 to vector<1x384xf32>
    %16 = arith.addf %15, %14 : vector<1x384xf32>
    %17 = arith.divf %15, %16 : vector<1x384xf32>
    %18 = vector.extract_strided_slice %11 {offsets = [0, 384], sizes = [1, 128], strides = [1, 1]} : vector<1x512xf32> to vector<1x128xf32>
    %19 = math.tanh %18 : vector<1x128xf32>
    %20 = vector.extract_strided_slice %17 {offsets = [0, 0], sizes = [1, 128], strides = [1, 1]} : vector<1x384xf32> to vector<1x128xf32>
    %21 = vector.extract_strided_slice %17 {offsets = [0, 128], sizes = [1, 128], strides = [1, 1]} : vector<1x384xf32> to vector<1x128xf32>
    %22 = vector.extract_strided_slice %17 {offsets = [0, 256], sizes = [1, 128], strides = [1, 1]} : vector<1x384xf32> to vector<1x128xf32>
    %23 = arith.mulf %21, %3 : vector<1x128xf32>
    %24 = arith.mulf %20, %19 : vector<1x128xf32>
    %25 = arith.addf %23, %24 : vector<1x128xf32>
    %26 = math.tanh %25 : vector<1x128xf32>
    %27 = arith.mulf %22, %26 : vector<1x128xf32>
    %c1 = arith.constant 1 : index
    %28 = memref.load %arg0[%c1] : memref<8xf32, #tpu.memory_space<smem>>
    %29 = vector.broadcast %28 : f32 to vector<1x512xf32>
    %30 = arith.mulf %29, %0 : vector<1x512xf32>
    %31 = arith.addf %30, %1 : vector<1x512xf32>
    %32 = vector.extract_strided_slice %27 {offsets = [0, 0], sizes = [1, 64], strides = [1, 1]} : vector<1x128xf32> to vector<1x64xf32>
    %c0_9 = arith.constant 0 : index
    %c0_10 = arith.constant 0 : index
    %33 = vector.load %arg3[%c0_9, %c0_10] : memref<64x512xf32, #tpu.memory_space<vmem>>, vector<64x512xf32>
    %cst_11 = arith.constant dense<0.000000e+00> : vector<1x512xf32>
    %34 = tpu.matmul %32, %33, %cst_11 {dimension_numbers = #tpu.dot_dimension_numbers<[1], [0], [0], [1], [0, 0, 1, 1], [], []>} : vector<1x64xf32>, vector<64x512xf32>, vector<1x512xf32> -> vector<1x512xf32>
    %35 = arith.addf %31, %34 : vector<1x512xf32>
    %36 = vector.extract_strided_slice %35 {offsets = [0, 0], sizes = [1, 384], strides = [1, 1]} : vector<1x512xf32> to vector<1x384xf32>
    %37 = arith.negf %36 : vector<1x384xf32>
    %38 = math.exp %37 : vector<1x384xf32>
    %cst_12 = arith.constant 1.000000e+00 : f32
    %39 = vector.broadcast %cst_12 : f32 to vector<1x384xf32>
    %40 = arith.addf %39, %38 : vector<1x384xf32>
    %41 = arith.divf %39, %40 : vector<1x384xf32>
    %42 = vector.extract_strided_slice %35 {offsets = [0, 384], sizes = [1, 128], strides = [1, 1]} : vector<1x512xf32> to vector<1x128xf32>
    %43 = math.tanh %42 : vector<1x128xf32>
    %44 = vector.extract_strided_slice %41 {offsets = [0, 0], sizes = [1, 128], strides = [1, 1]} : vector<1x384xf32> to vector<1x128xf32>
    %45 = vector.extract_strided_slice %41 {offsets = [0, 128], sizes = [1, 128], strides = [1, 1]} : vector<1x384xf32> to vector<1x128xf32>
    %46 = vector.extract_strided_slice %41 {offsets = [0, 256], sizes = [1, 128], strides = [1, 1]} : vector<1x384xf32> to vector<1x128xf32>
    %47 = arith.mulf %45, %25 : vector<1x128xf32>
    %48 = arith.mulf %44, %43 : vector<1x128xf32>
    %49 = arith.addf %47, %48 : vector<1x128xf32>
    %50 = math.tanh %49 : vector<1x128xf32>
    %51 = arith.mulf %46, %50 : vector<1x128xf32>
    %c2 = arith.constant 2 : index
    %52 = memref.load %arg0[%c2] : memref<8xf32, #tpu.memory_space<smem>>
    %53 = vector.broadcast %52 : f32 to vector<1x512xf32>
    %54 = arith.mulf %53, %0 : vector<1x512xf32>
    %55 = arith.addf %54, %1 : vector<1x512xf32>
    %56 = vector.extract_strided_slice %51 {offsets = [0, 0], sizes = [1, 64], strides = [1, 1]} : vector<1x128xf32> to vector<1x64xf32>
    %c0_13 = arith.constant 0 : index
    %c0_14 = arith.constant 0 : index
    %57 = vector.load %arg3[%c0_13, %c0_14] : memref<64x512xf32, #tpu.memory_space<vmem>>, vector<64x512xf32>
    %cst_15 = arith.constant dense<0.000000e+00> : vector<1x512xf32>
    %58 = tpu.matmul %56, %57, %cst_15 {dimension_numbers = #tpu.dot_dimension_numbers<[1], [0], [0], [1], [0, 0, 1, 1], [], []>} : vector<1x64xf32>, vector<64x512xf32>, vector<1x512xf32> -> vector<1x512xf32>
    %59 = arith.addf %55, %58 : vector<1x512xf32>
    %60 = vector.extract_strided_slice %59 {offsets = [0, 0], sizes = [1, 384], strides = [1, 1]} : vector<1x512xf32> to vector<1x384xf32>
    %61 = arith.negf %60 : vector<1x384xf32>
    %62 = math.exp %61 : vector<1x384xf32>
    %cst_16 = arith.constant 1.000000e+00 : f32
    %63 = vector.broadcast %cst_16 : f32 to vector<1x384xf32>
    %64 = arith.addf %63, %62 : vector<1x384xf32>
    %65 = arith.divf %63, %64 : vector<1x384xf32>
    %66 = vector.extract_strided_slice %59 {offsets = [0, 384], sizes = [1, 128], strides = [1, 1]} : vector<1x512xf32> to vector<1x128xf32>
    %67 = math.tanh %66 : vector<1x128xf32>
    %68 = vector.extract_strided_slice %65 {offsets = [0, 0], sizes = [1, 128], strides = [1, 1]} : vector<1x384xf32> to vector<1x128xf32>
    %69 = vector.extract_strided_slice %65 {offsets = [0, 128], sizes = [1, 128], strides = [1, 1]} : vector<1x384xf32> to vector<1x128xf32>
    %70 = vector.extract_strided_slice %65 {offsets = [0, 256], sizes = [1, 128], strides = [1, 1]} : vector<1x384xf32> to vector<1x128xf32>
    %71 = arith.mulf %69, %49 : vector<1x128xf32>
    %72 = arith.mulf %68, %67 : vector<1x128xf32>
    %73 = arith.addf %71, %72 : vector<1x128xf32>
    %74 = math.tanh %73 : vector<1x128xf32>
    %75 = arith.mulf %70, %74 : vector<1x128xf32>
    %c3 = arith.constant 3 : index
    %76 = memref.load %arg0[%c3] : memref<8xf32, #tpu.memory_space<smem>>
    %77 = vector.broadcast %76 : f32 to vector<1x512xf32>
    %78 = arith.mulf %77, %0 : vector<1x512xf32>
    %79 = arith.addf %78, %1 : vector<1x512xf32>
    %80 = vector.extract_strided_slice %75 {offsets = [0, 0], sizes = [1, 64], strides = [1, 1]} : vector<1x128xf32> to vector<1x64xf32>
    %c0_17 = arith.constant 0 : index
    %c0_18 = arith.constant 0 : index
    %81 = vector.load %arg3[%c0_17, %c0_18] : memref<64x512xf32, #tpu.memory_space<vmem>>, vector<64x512xf32>
    %cst_19 = arith.constant dense<0.000000e+00> : vector<1x512xf32>
    %82 = tpu.matmul %80, %81, %cst_19 {dimension_numbers = #tpu.dot_dimension_numbers<[1], [0], [0], [1], [0, 0, 1, 1], [], []>} : vector<1x64xf32>, vector<64x512xf32>, vector<1x512xf32> -> vector<1x512xf32>
    %83 = arith.addf %79, %82 : vector<1x512xf32>
    %84 = vector.extract_strided_slice %83 {offsets = [0, 0], sizes = [1, 384], strides = [1, 1]} : vector<1x512xf32> to vector<1x384xf32>
    %85 = arith.negf %84 : vector<1x384xf32>
    %86 = math.exp %85 : vector<1x384xf32>
    %cst_20 = arith.constant 1.000000e+00 : f32
    %87 = vector.broadcast %cst_20 : f32 to vector<1x384xf32>
    %88 = arith.addf %87, %86 : vector<1x384xf32>
    %89 = arith.divf %87, %88 : vector<1x384xf32>
    %90 = vector.extract_strided_slice %83 {offsets = [0, 384], sizes = [1, 128], strides = [1, 1]} : vector<1x512xf32> to vector<1x128xf32>
    %91 = math.tanh %90 : vector<1x128xf32>
    %92 = vector.extract_strided_slice %89 {offsets = [0, 0], sizes = [1, 128], strides = [1, 1]} : vector<1x384xf32> to vector<1x128xf32>
    %93 = vector.extract_strided_slice %89 {offsets = [0, 128], sizes = [1, 128], strides = [1, 1]} : vector<1x384xf32> to vector<1x128xf32>
    %94 = vector.extract_strided_slice %89 {offsets = [0, 256], sizes = [1, 128], strides = [1, 1]} : vector<1x384xf32> to vector<1x128xf32>
    %95 = arith.mulf %93, %73 : vector<1x128xf32>
    %96 = arith.mulf %92, %91 : vector<1x128xf32>
    %97 = arith.addf %95, %96 : vector<1x128xf32>
    %98 = math.tanh %97 : vector<1x128xf32>
    %99 = arith.mulf %94, %98 : vector<1x128xf32>
    %c4 = arith.constant 4 : index
    %100 = memref.load %arg0[%c4] : memref<8xf32, #tpu.memory_space<smem>>
    %101 = vector.broadcast %100 : f32 to vector<1x512xf32>
    %102 = arith.mulf %101, %0 : vector<1x512xf32>
    %103 = arith.addf %102, %1 : vector<1x512xf32>
    %104 = vector.extract_strided_slice %99 {offsets = [0, 0], sizes = [1, 64], strides = [1, 1]} : vector<1x128xf32> to vector<1x64xf32>
    %c0_21 = arith.constant 0 : index
    %c0_22 = arith.constant 0 : index
    %105 = vector.load %arg3[%c0_21, %c0_22] : memref<64x512xf32, #tpu.memory_space<vmem>>, vector<64x512xf32>
    %cst_23 = arith.constant dense<0.000000e+00> : vector<1x512xf32>
    %106 = tpu.matmul %104, %105, %cst_23 {dimension_numbers = #tpu.dot_dimension_numbers<[1], [0], [0], [1], [0, 0, 1, 1], [], []>} : vector<1x64xf32>, vector<64x512xf32>, vector<1x512xf32> -> vector<1x512xf32>
    %107 = arith.addf %103, %106 : vector<1x512xf32>
    %108 = vector.extract_strided_slice %107 {offsets = [0, 0], sizes = [1, 384], strides = [1, 1]} : vector<1x512xf32> to vector<1x384xf32>
    %109 = arith.negf %108 : vector<1x384xf32>
    %110 = math.exp %109 : vector<1x384xf32>
    %cst_24 = arith.constant 1.000000e+00 : f32
    %111 = vector.broadcast %cst_24 : f32 to vector<1x384xf32>
    %112 = arith.addf %111, %110 : vector<1x384xf32>
    %113 = arith.divf %111, %112 : vector<1x384xf32>
    %114 = vector.extract_strided_slice %107 {offsets = [0, 384], sizes = [1, 128], strides = [1, 1]} : vector<1x512xf32> to vector<1x128xf32>
    %115 = math.tanh %114 : vector<1x128xf32>
    %116 = vector.extract_strided_slice %113 {offsets = [0, 0], sizes = [1, 128], strides = [1, 1]} : vector<1x384xf32> to vector<1x128xf32>
    %117 = vector.extract_strided_slice %113 {offsets = [0, 128], sizes = [1, 128], strides = [1, 1]} : vector<1x384xf32> to vector<1x128xf32>
    %118 = vector.extract_strided_slice %113 {offsets = [0, 256], sizes = [1, 128], strides = [1, 1]} : vector<1x384xf32> to vector<1x128xf32>
    %119 = arith.mulf %117, %97 : vector<1x128xf32>
    %120 = arith.mulf %116, %115 : vector<1x128xf32>
    %121 = arith.addf %119, %120 : vector<1x128xf32>
    %122 = math.tanh %121 : vector<1x128xf32>
    %123 = arith.mulf %118, %122 : vector<1x128xf32>
    %c5 = arith.constant 5 : index
    %124 = memref.load %arg0[%c5] : memref<8xf32, #tpu.memory_space<smem>>
    %125 = vector.broadcast %124 : f32 to vector<1x512xf32>
    %126 = arith.mulf %125, %0 : vector<1x512xf32>
    %127 = arith.addf %126, %1 : vector<1x512xf32>
    %128 = vector.extract_strided_slice %123 {offsets = [0, 0], sizes = [1, 64], strides = [1, 1]} : vector<1x128xf32> to vector<1x64xf32>
    %c0_25 = arith.constant 0 : index
    %c0_26 = arith.constant 0 : index
    %129 = vector.load %arg3[%c0_25, %c0_26] : memref<64x512xf32, #tpu.memory_space<vmem>>, vector<64x512xf32>
    %cst_27 = arith.constant dense<0.000000e+00> : vector<1x512xf32>
    %130 = tpu.matmul %128, %129, %cst_27 {dimension_numbers = #tpu.dot_dimension_numbers<[1], [0], [0], [1], [0, 0, 1, 1], [], []>} : vector<1x64xf32>, vector<64x512xf32>, vector<1x512xf32> -> vector<1x512xf32>
    %131 = arith.addf %127, %130 : vector<1x512xf32>
    %132 = vector.extract_strided_slice %131 {offsets = [0, 0], sizes = [1, 384], strides = [1, 1]} : vector<1x512xf32> to vector<1x384xf32>
    %133 = arith.negf %132 : vector<1x384xf32>
    %134 = math.exp %133 : vector<1x384xf32>
    %cst_28 = arith.constant 1.000000e+00 : f32
    %135 = vector.broadcast %cst_28 : f32 to vector<1x384xf32>
    %136 = arith.addf %135, %134 : vector<1x384xf32>
    %137 = arith.divf %135, %136 : vector<1x384xf32>
    %138 = vector.extract_strided_slice %131 {offsets = [0, 384], sizes = [1, 128], strides = [1, 1]} : vector<1x512xf32> to vector<1x128xf32>
    %139 = math.tanh %138 : vector<1x128xf32>
    %140 = vector.extract_strided_slice %137 {offsets = [0, 0], sizes = [1, 128], strides = [1, 1]} : vector<1x384xf32> to vector<1x128xf32>
    %141 = vector.extract_strided_slice %137 {offsets = [0, 128], sizes = [1, 128], strides = [1, 1]} : vector<1x384xf32> to vector<1x128xf32>
    %142 = vector.extract_strided_slice %137 {offsets = [0, 256], sizes = [1, 128], strides = [1, 1]} : vector<1x384xf32> to vector<1x128xf32>
    %143 = arith.mulf %141, %121 : vector<1x128xf32>
    %144 = arith.mulf %140, %139 : vector<1x128xf32>
    %145 = arith.addf %143, %144 : vector<1x128xf32>
    %146 = math.tanh %145 : vector<1x128xf32>
    %147 = arith.mulf %142, %146 : vector<1x128xf32>
    %c6 = arith.constant 6 : index
    %148 = memref.load %arg0[%c6] : memref<8xf32, #tpu.memory_space<smem>>
    %149 = vector.broadcast %148 : f32 to vector<1x512xf32>
    %150 = arith.mulf %149, %0 : vector<1x512xf32>
    %151 = arith.addf %150, %1 : vector<1x512xf32>
    %152 = vector.extract_strided_slice %147 {offsets = [0, 0], sizes = [1, 64], strides = [1, 1]} : vector<1x128xf32> to vector<1x64xf32>
    %c0_29 = arith.constant 0 : index
    %c0_30 = arith.constant 0 : index
    %153 = vector.load %arg3[%c0_29, %c0_30] : memref<64x512xf32, #tpu.memory_space<vmem>>, vector<64x512xf32>
    %cst_31 = arith.constant dense<0.000000e+00> : vector<1x512xf32>
    %154 = tpu.matmul %152, %153, %cst_31 {dimension_numbers = #tpu.dot_dimension_numbers<[1], [0], [0], [1], [0, 0, 1, 1], [], []>} : vector<1x64xf32>, vector<64x512xf32>, vector<1x512xf32> -> vector<1x512xf32>
    %155 = arith.addf %151, %154 : vector<1x512xf32>
    %156 = vector.extract_strided_slice %155 {offsets = [0, 0], sizes = [1, 384], strides = [1, 1]} : vector<1x512xf32> to vector<1x384xf32>
    %157 = arith.negf %156 : vector<1x384xf32>
    %158 = math.exp %157 : vector<1x384xf32>
    %cst_32 = arith.constant 1.000000e+00 : f32
    %159 = vector.broadcast %cst_32 : f32 to vector<1x384xf32>
    %160 = arith.addf %159, %158 : vector<1x384xf32>
    %161 = arith.divf %159, %160 : vector<1x384xf32>
    %162 = vector.extract_strided_slice %155 {offsets = [0, 384], sizes = [1, 128], strides = [1, 1]} : vector<1x512xf32> to vector<1x128xf32>
    %163 = math.tanh %162 : vector<1x128xf32>
    %164 = vector.extract_strided_slice %161 {offsets = [0, 0], sizes = [1, 128], strides = [1, 1]} : vector<1x384xf32> to vector<1x128xf32>
    %165 = vector.extract_strided_slice %161 {offsets = [0, 128], sizes = [1, 128], strides = [1, 1]} : vector<1x384xf32> to vector<1x128xf32>
    %166 = vector.extract_strided_slice %161 {offsets = [0, 256], sizes = [1, 128], strides = [1, 1]} : vector<1x384xf32> to vector<1x128xf32>
    %167 = arith.mulf %165, %145 : vector<1x128xf32>
    %168 = arith.mulf %164, %163 : vector<1x128xf32>
    %169 = arith.addf %167, %168 : vector<1x128xf32>
    %170 = math.tanh %169 : vector<1x128xf32>
    %171 = arith.mulf %166, %170 : vector<1x128xf32>
    %c7 = arith.constant 7 : index
    %172 = memref.load %arg0[%c7] : memref<8xf32, #tpu.memory_space<smem>>
    %173 = vector.broadcast %172 : f32 to vector<1x512xf32>
    %174 = arith.mulf %173, %0 : vector<1x512xf32>
    %175 = arith.addf %174, %1 : vector<1x512xf32>
    %176 = vector.extract_strided_slice %171 {offsets = [0, 0], sizes = [1, 64], strides = [1, 1]} : vector<1x128xf32> to vector<1x64xf32>
    %c0_33 = arith.constant 0 : index
    %c0_34 = arith.constant 0 : index
    %177 = vector.load %arg3[%c0_33, %c0_34] : memref<64x512xf32, #tpu.memory_space<vmem>>, vector<64x512xf32>
    %cst_35 = arith.constant dense<0.000000e+00> : vector<1x512xf32>
    %178 = tpu.matmul %176, %177, %cst_35 {dimension_numbers = #tpu.dot_dimension_numbers<[1], [0], [0], [1], [0, 0, 1, 1], [], []>} : vector<1x64xf32>, vector<64x512xf32>, vector<1x512xf32> -> vector<1x512xf32>
    %179 = arith.addf %175, %178 : vector<1x512xf32>
    %180 = vector.extract_strided_slice %179 {offsets = [0, 0], sizes = [1, 384], strides = [1, 1]} : vector<1x512xf32> to vector<1x384xf32>
    %181 = arith.negf %180 : vector<1x384xf32>
    %182 = math.exp %181 : vector<1x384xf32>
    %cst_36 = arith.constant 1.000000e+00 : f32
    %183 = vector.broadcast %cst_36 : f32 to vector<1x384xf32>
    %184 = arith.addf %183, %182 : vector<1x384xf32>
    %185 = arith.divf %183, %184 : vector<1x384xf32>
    %186 = vector.extract_strided_slice %179 {offsets = [0, 384], sizes = [1, 128], strides = [1, 1]} : vector<1x512xf32> to vector<1x128xf32>
    %187 = math.tanh %186 : vector<1x128xf32>
    %188 = vector.extract_strided_slice %185 {offsets = [0, 0], sizes = [1, 128], strides = [1, 1]} : vector<1x384xf32> to vector<1x128xf32>
    %189 = vector.extract_strided_slice %185 {offsets = [0, 128], sizes = [1, 128], strides = [1, 1]} : vector<1x384xf32> to vector<1x128xf32>
    %190 = vector.extract_strided_slice %185 {offsets = [0, 256], sizes = [1, 128], strides = [1, 1]} : vector<1x384xf32> to vector<1x128xf32>
    %191 = arith.mulf %189, %169 : vector<1x128xf32>
    %192 = arith.mulf %188, %187 : vector<1x128xf32>
    %193 = arith.addf %191, %192 : vector<1x128xf32>
    %194 = math.tanh %193 : vector<1x128xf32>
    %195 = arith.mulf %190, %194 : vector<1x128xf32>
    %c0_37 = arith.constant 0 : index
    %c0_38 = arith.constant 0 : index
    %196 = vector.load %arg4[%c0_37, %c0_38] : memref<1x128xf32, #tpu.memory_space<vmem>>, vector<1x128xf32>
    %197 = arith.mulf %195, %196 : vector<1x128xf32>
    %cst_39 = arith.constant dense<0.000000e+00> : vector<1xf32>
    %198 = vector.multi_reduction <add>, %197, %cst_39 [1] : vector<1x128xf32> to vector<1xf32>
    %199 = vector.shape_cast %198 : vector<1xf32> to vector<1x1xf32>
    %c0_40 = arith.constant 0 : index
    %c0_41 = arith.constant 0 : index
    %200 = vector.load %arg5[%c0_40, %c0_41] : memref<1x1xf32, #tpu.memory_space<vmem>>, vector<1x1xf32>
    %201 = arith.addf %199, %200 : vector<1x1xf32>
    %c0_42 = arith.constant 0 : index
    %c0_43 = arith.constant 0 : index
    %202 = vector.load %arg6[%c0_42, %c0_43] : memref<1x1xf32, #tpu.memory_space<vmem>>, vector<1x1xf32>
    tpu.vector_store %arg6[%c0_42, %c0_43], %201 {strides = array<i32>} : memref<1x1xf32, #tpu.memory_space<vmem>>, vector<1x1xf32>,
    return
  }
}

</mosaic_0001>

<bundles_post_ra>
// kernel: lstm_forward.1
= control target key start
LH: loop header
LB: loop body
LE: loop exit
PB: predicated region body
PF: predicated region fallthrough
CT: control target
= control target key end

     0   :  { %s2443_s0 = inlined_call_operand.vmem [shape: f32[8], index: 0, kind: input, shape index: {}]   ;;  %s2444_s1 = inlined_call_operand.vmem [shape: f32[1,512], index: 1, kind: input, shape index: {}]   ;;  %s2445_s2 = inlined_call_operand.vmem [shape: f32[1,512], index: 2, kind: input, shape index: {}]   ;;  %s2446_s3 = inlined_call_operand.hbm [shape: f32[64,512], index: 3, kind: input, shape index: {}]   ;;  %s2447_s4 = inlined_call_operand.vmem [shape: f32[1,128], index: 4, kind: input, shape index: {}]   ;;  %s2448_s5 = inlined_call_operand.<no memory space> [shape: f32[1,1], index: 5, kind: input, shape index: {}]   ;;  %s2449_s6 = inlined_call_operand.hbm [shape: f32[1,1], index: 6, kind: output, shape index: {}]  }
   0x1   :  { %v11_v0 = vstv %s2448_s5 }
   0x2   :  { %12 = vst [vmem:[#allocation2] sm:$0x1] %v11_v0 }
   0x3   :  { %13 = vsyncpa [#allocation6], 0 }
   0x4   :  { %14 = vsyncpa [#allocation4], 0 }
   0x5   :  { %15 = vsyncpa [#allocation5], 0  ;;  %s22_s25 = sshll.u32 %s2443_s0, 4  ;;  %s23_s25 = int_to_ptr.vmem [resolvable:$true] %s22_s25 }
   0x6   :  { %s2062_s26 = scalar_lea.vmem %s23_s25, 16  ;;  %p2067_p1 = scmp.lt.s32.totalorder %s23_s25, %s23_s25 }
   0x7   :  { %p2063_p0 = scmp.ne.s32.totalorder %s23_s25, %s2062_s26  ;;  %p2068_p2 = scmp.lt.s32.totalorder %s2062_s26, %s2062_s26 }
   0x9   :  { %p2069_p3 = por %p2068_p2, %p2067_p1 }
   0xb   :  { %p2070_p4 = pnand %p2069_p3, %p2063_p0 }
   0xd   :  { %2073 = shalt.err (!%p2070_p4)
}
   0xe   :  { %s2124_s27 = smov [#allocation3]   ;;  %s2125_s28 = smov [#allocation7]  }
   0xf   :  { %25 = dma.vmem_to_smem %s23_s25, 16, %s2124_s27, [#allocation6]  }
  0x10   :  { %s35_s5 = sshll.u32 %s2125_s28, 4  ;;  %s2074_s7 = scalar_lea.hbm %s2446_s3, 4096  ;;  %s36_s5 = int_to_ptr.vmem [resolvable:$true] %s35_s5 }
  0x11   :  { %p2075_p5 = scmp.ne.s32.totalorder %s2446_s3, %s2074_s7  ;;  %p2078_p6 = scmp.lt.u32.totalorder %s2074_s7, %s2446_s3 }
  0x13   :  { %p2080_p7 = pnand %p2078_p6, %p2075_p5 }
  0x15   :  { %2083 = shalt.err (!%p2080_p7)
}
  0x16   :  { %s2084_s11 = scalar_lea.vmem %s36_s5, 4096  ;;  %p2089_p9 = scmp.lt.s32.totalorder %s36_s5, %s36_s5 }
  0x17   :  { %p2085_p8 = scmp.ne.s32.totalorder %s36_s5, %s2084_s11  ;;  %p2090_p10 = scmp.lt.s32.totalorder %s2084_s11, %s2084_s11 }
  0x19   :  { %p2091_p11 = por %p2090_p10, %p2089_p9 }
  0x1b   :  { %p2092_p12 = pnand %p2091_p11, %p2085_p8 }
  0x1d   :  { %2095 = shalt.err (!%p2092_p12)
}
  0x1e   :  { %s2126_s12 = smov 512   ;;  %s2127_s13 = smov 32  }
  0x1f   :  { %41 = dma.hbm_to_vmem [thread:$0]  %s2446_s3, 4096, %s36_s5, [#allocation4], %s2126_s12, %s2126_s12, %s2127_s13  }
  0x20   :  { %2118 = dma.done.wait [#allocation6], 16  }
  0x21   :  { %2119 = vsyncadd [#allocation6], 4294967280 }
  0x22   :  { %2120 = dma.done.wait [#allocation4], 4096  }
  0x23   :  { %2121 = vsyncadd [#allocation4], 4294963200 }
  0x24   :  { %52 = sfence }
  0x25   :  { %v60_v1 = vld [vmem:[#allocation7 + $0x8] sm:$0xff]  ;;  %v62_v3 = vld [vmem:[#allocation7 + $0x18] sm:$0xff]  ;;  %v59_v6 = vld [vmem:[#allocation7] sm:$0xff]  ;;  %v2128_v8 = vmov 0.0   ;;  %v2129_v50 = vmov 1966171168   ;;  %v246_v52 = vlaneseq }
  0x26   :  { %v64_v2 = vld [vmem:[#allocation7 + $0x28] sm:$0xff]  ;;  %v66_v5 = vld [vmem:[#allocation7 + $0x38] sm:$0xff]  ;;  %v63_v7 = vld [vmem:[#allocation7 + $0x20] sm:$0xff]  ;;  %159 = vmatprep.mubr.f32.mxu0 %v2128_v8  ;;  %230 = vmatprep.mubr.f32.mxu1 %v2128_v8  ;;  %v244_v51 = vunpack.c.l.s4 %v2129_v50  ;;  %s55_s3 = sld [smem:[#allocation3]]  ;;  %vm91_vm0 = vcmask 523264   ;;  %s1715_s20 = sld [smem:[#allocation3 + $0x3]] }
  0x27   :  { %v2184_v4 = vpack.c.bf16 %v64_v2, %v60_v1  ;;  %v2188_v9 = vpack.c.bf16 %v66_v5, %v62_v3  ;;  %v2190_v10 = vpack.c.bf16 %v63_v7, %v59_v6  ;;  %v61_v11 = vld [vmem:[#allocation7 + $0x10] sm:$0xff]  ;;  %v68_v13 = vld [vmem:[#allocation7 + $0x48] sm:$0xff]  ;;  %v70_v16 = vld [vmem:[#allocation7 + $0x58] sm:$0xff]  ;;  %v247_v54 = vshrl.u32 %v246_v52, 7  ;;  %s1719_s21 = sld [smem:[#allocation3 + $0x4]]  ;;  %s1723_s22 = sld [smem:[#allocation3 + $0x5]] }
  0x28   :  { %v65_v12 = vld [vmem:[#allocation7 + $0x30] sm:$0xff]  ;;  %v72_v15 = vld [vmem:[#allocation7 + $0x68] sm:$0xff]  ;;  %v74_v17 = vld [vmem:[#allocation7 + $0x78] sm:$0xff]  ;;  %v245_v53 = vunpack.c.0.s8 %v244_v51  ;;  %s1727_s23 = sld [smem:[#allocation3 + $0x6]]  ;;  %s1731_s24 = sld [smem:[#allocation3 + $0x7]]  ;;  %vm1682_vm1 = vcmask 1040384  }
  0x29   :  { %1736 = vmatprep.subr.bf16.mxu0 %v2184_v4  ;;  %v2193_v14 = vpack.c.bf16 %v65_v12, %v61_v11  ;;  %1752 = vmatprep.subr.bf16.mxu1 %v2188_v9  ;;  %v2197_v18 = vpack.c.bf16 %v72_v15, %v68_v13  ;;  %v2199_v19 = vpack.c.bf16 %v74_v17, %v70_v16  ;;  %v67_v20 = vld [vmem:[#allocation7 + $0x40] sm:$0xff]  ;;  %v69_v22 = vld [vmem:[#allocation7 + $0x50] sm:$0xff]  ;;  %v76_v25 = vld [vmem:[#allocation7 + $0x88] sm:$0xff]  ;;  %s2130_s27 = smov [#allocation8]   ;;  %vm1688_vm2 = vcmask 0  }
  0x2a   :  { %1738 = vmatpush1.bf16.msra.mxu0 %v2190_v10  ;;  %v71_v21 = vld [vmem:[#allocation7 + $0x60] sm:$0xff]  ;;  %v73_v24 = vld [vmem:[#allocation7 + $0x70] sm:$0xff]  ;;  %v80_v26 = vld [vmem:[#allocation7 + $0xa8] sm:$0xff]  ;;  %v2256_v56 = vsub.s32 %v245_v53, %v247_v54  ;;  %s1696_s28 = sshll.u32 %s2130_s27, 4  ;;  %s1697_s28 = int_to_ptr.vmem [resolvable:$true] %s1696_s28 }
  0x2b   :  { %1754 = vmatpush1.bf16.msra.mxu1 %v2193_v14  ;;  %v2202_v23 = vpack.c.bf16 %v71_v21, %v67_v20  ;;  %1740 = vmatprep.subr.bf16.mxu0 %v2197_v18  ;;  %v2206_v27 = vpack.c.bf16 %v73_v24, %v69_v22  ;;  %v2208_v28 = vpack.c.bf16 %v80_v26, %v76_v25  ;;  %v78_v29 = vld [vmem:[#allocation7 + $0x98] sm:$0xff]  ;;  %v75_v31 = vld [vmem:[#allocation7 + $0x80] sm:$0xff]  ;;  %v77_v34 = vld [vmem:[#allocation7 + $0x90] sm:$0xff]  ;;  %s2096_s5 = scalar_lea.vmem %s1697_s28, 16  ;;  %s2100_s29 = scalar_lea.vmem %s1697_s28, 32 }
  0x2c   :  { %1756 = vmatprep.subr.bf16.mxu1 %v2199_v19  ;;  %v82_v30 = vld [vmem:[#allocation7 + $0xb8] sm:$0xff]  ;;  %v79_v33 = vld [vmem:[#allocation7 + $0xa0] sm:$0xff]  ;;  %v81_v35 = vld [vmem:[#allocation7 + $0xb0] sm:$0xff]  ;;  %v56_v58 = vstv %s55_s3  ;;  %p2097_p13 = scmp.ne.s32.totalorder %s1697_s28, %s2096_s5  ;;  %p2101_p0 = scmp.lt.s32.totalorder %s1697_s28, %s1697_s28 }
  0x2d   :  { %v2210_v32 = vpack.c.bf16 %v82_v30, %v78_v29  ;;  %v2213_v36 = vpack.c.bf16 %v79_v33, %v75_v31  ;;  %v84_v37 = vld [vmem:[#allocation7 + $0xc8] sm:$0xff]  ;;  %v86_v39 = vld [vmem:[#allocation7 + $0xd8] sm:$0xff]  ;;  %v2217_v40 = vpack.c.bf16 %v81_v35, %v77_v34  ;;  %v83_v43 = vld [vmem:[#allocation7 + $0xc0] sm:$0xff]  ;;  %p2102_p1 = scmp.lt.s32.totalorder %s2100_s29, %s2096_s5 }
  0x2e   :  { %1742 = vmatpush1.bf16.msra.mxu0 %v2202_v23  ;;  %v88_v38 = vld [vmem:[#allocation7 + $0xe8] sm:$0xff]  ;;  %v90_v42 = vld [vmem:[#allocation7 + $0xf8] sm:$0xff]  ;;  %v87_v44 = vld [vmem:[#allocation7 + $0xe0] sm:$0xff] }
  0x2f   :  { %1758 = vmatpush1.bf16.msra.mxu1 %v2206_v27  ;;  %1744 = vmatprep.subr.bf16.mxu0 %v2208_v28  ;;  %v2219_v41 = vpack.c.bf16 %v88_v38, %v84_v37  ;;  %v2222_v45 = vpack.c.bf16 %v90_v42, %v86_v39  ;;  %v85_v46 = vld [vmem:[#allocation7 + $0xd0] sm:$0xff]  ;;  %v2225_v48 = vpack.c.bf16 %v87_v44, %v83_v43  ;;  %v2261_v57 = vld [vmem:[%s2444_s1] sm:$0xf]  ;;  %s1707_s1 = sld [smem:[#allocation3 + $0x1]]  ;;  %p2103_p2 = por %p2102_p1, %p2101_p0 }
  0x30   :  { %1760 = vmatprep.subr.bf16.mxu1 %v2210_v32  ;;  %v89_v47 = vld [vmem:[#allocation7 + $0xf0] sm:$0xff]  ;;  %v57_v63 = vmul.f32 %v56_v58, %v2261_v57  ;;  %v2268_v2 = vld [vmem:[%s2445_s2] sm:$0xf]  ;;  %s1711_s2 = sld [smem:[#allocation3 + $0x2]] }
  0x31   :  { %v2229_v49 = vpack.c.bf16 %v89_v47, %v85_v46  ;;  %p2104_p3 = pnand %p2103_p2, %p2097_p13 }
  0x32   :  { %1746 = vmatpush1.bf16.msra.mxu0 %v2213_v36  ;;  %v58_v5 = vadd.f32 %v57_v63, %v2268_v2 }
  0x33   :  { %1762 = vmatpush1.bf16.msra.mxu1 %v2217_v40  ;;  %1748 = vmatprep.subr.bf16.mxu0 %v2219_v41 }
  0x34   :  { %1764 = vmatprep.subr.bf16.mxu1 %v2222_v45 }
  0x35   :  { %v288_v31 = vstv %s1707_s1 }
  0x36   :  { %1750 = vmatpush1.bf16.msra.mxu0 %v2225_v48  ;;  %v289_v39 = vmul.f32 %v288_v31, %v2261_v57 }
  0x37   :  { %1766 = vmatpush1.bf16.msra.mxu1 %v2229_v49  ;;  %1768 = vmatprep.subr.bf16.mxu0 %v2184_v4 }
  0x38   :  { %1784 = vmatprep.subr.bf16.mxu1 %v2188_v9  ;;  %v290_v46 = vadd.f32 %v289_v39, %v2268_v2 }
  0x39   :  { %160 = vmatmul.mubr.f32.vlgmr.msra.gmra.mrb[0].mxu0 %v2128_v8 }
  0x3a   :  { %231 = vmatmul.mubr.f32.vlgmr.msra.gmra.mrb[0].mxu1 %v2128_v8  ;;  %1770 = vmatpush1.bf16.msra.mxu0 %v2190_v10 }
  0x3b   :  { %1786 = vmatpush1.bf16.msra.mxu1 %v2193_v14  ;;  %1772 = vmatprep.subr.bf16.mxu0 %v2197_v18 }
  0x3c   :  { %1788 = vmatprep.subr.bf16.mxu1 %v2199_v19  ;;  %358 = vmatprep.mubr.f32.mxu0 %v2128_v8 }
  0x3d   :  { %429 = vmatprep.mubr.f32.mxu1 %v2128_v8 }
  0x3e   :  { %1774 = vmatpush1.bf16.msra.mxu0 %v2202_v23 }
  0x3f   :  { %1790 = vmatpush1.bf16.msra.mxu1 %v2206_v27  ;;  %1776 = vmatprep.subr.bf16.mxu0 %v2208_v28 }
  0x40   :  { %1792 = vmatprep.subr.bf16.mxu1 %v2210_v32 }
  0x42   :  { %1778 = vmatpush1.bf16.msra.mxu0 %v2213_v36 }
  0x43   :  { %1794 = vmatpush1.bf16.msra.mxu1 %v2217_v40  ;;  %1780 = vmatprep.subr.bf16.mxu0 %v2219_v41 }
  0x44   :  { %1796 = vmatprep.subr.bf16.mxu1 %v2222_v45 }
  0x46   :  { %1782 = vmatpush1.bf16.msra.mxu0 %v2225_v48 }
  0x47   :  { %1798 = vmatpush1.bf16.msra.mxu1 %v2229_v49  ;;  %1800 = vmatprep.subr.bf16.mxu0 %v2184_v4 }
  0x48   :  { %1816 = vmatprep.subr.bf16.mxu1 %v2188_v9 }
 0x10c   :  { %v161_v55 = vpop.f32.mrb[0].mxu0 }
 0x10d   :  { %v232_v59 = vpop.f32.mrb[0].mxu1  ;;  %v163_v60 = vpop.f32.mrb[1].mxu0 }
 0x10e   :  { %v241_v61 = vcombine.low %v161_v55, %v163_v60  ;;  %v234_v62 = vpop.f32.mrb[1].mxu1 }
 0x10f   :  { %v242_v0 = vcombine.low %v232_v59, %v234_v62 }
 0x110   :  { %v249_v1 = vrot.slane %v241_v61, %v2256_v56 }
 0x111   :  { %v256_v3 = vrot.slane %v242_v0, %v2256_v56 }
 0x113   :  { %v257_v6 = vcombine.low %v249_v1, %v256_v3 }
 0x115   :  { %v264_v7 = vrot.slane %v257_v6, %v2256_v56 }
 0x117   :  { %v266_v11 = vadd.f32 %v264_v7, %v58_v5  ;;  %v487_v5 = vstv %s1711_s2 }
 0x119   :  { %v1706_v12 = vmul.f32 -1.442695, %v266_v11  ;;  %v274_v16 = vrot.slane %v266_v11, 3 }
 0x11b   :  { %1998 = vpow2.f32 %v1706_v12 }
 0x125   :  { %v1999_v13 = vpop.eup %1998 }
 0x126   :  { %v270_v15 = vadd.f32 1.0, %v1999_v13 }
 0x128   :  { %2000 = vrcp.f32 %v270_v15  ;;  %v488_v15 = vmul.f32 %v487_v5, %v2261_v57 }
 0x129   :  { %2002 = vtanh.f32 %v274_v16 }
 0x132   :  { %v2001_v17 = vpop.eup %2000 }
 0x133   :  { %v278_v20 = vrot.slane %v2001_v17, 1  ;;  %v2003_v21 = vpop.eup %2002  ;;  %v284_v26 = vrot.slane %v2001_v17, 2 }
 0x134   :  { %v281_v24 = vmul.f32 %v2003_v21, %v2001_v17  ;;  %v489_v21 = vadd.f32 %v488_v15, %v2268_v2 }
 0x135   :  { %v280_v22 = vmul.f32 0.0, %v278_v20 }
 0x137   :  { %v282_v25 = vadd.f32 %v281_v24, %v280_v22 }
 0x139   :  { %2004 = vtanh.f32 %v282_v25 }
 0x143   :  { %v2005_v29 = vpop.eup %2004 }
 0x144   :  { %v286_v30 = vmul.f32 %v2005_v29, %v284_v26 }
 0x146   :  { %1708 = vmatmul.mubr.msk.f32.vlgmr.msra.gmra.mrb[2].mxu0 %vm91_vm0, %v286_v30  ;;  %1709 = vmatmul.mubr.msk.f32.vlgmr.msra.gmra.mrb[2].mxu1 %vm91_vm0, %v286_v30 }
 0x147   :  { %1802 = vmatpush1.bf16.msra.mxu0 %v2190_v10  ;;  %1818 = vmatpush1.bf16.msra.mxu1 %v2193_v14 }
 0x148   :  { %1804 = vmatprep.subr.bf16.mxu0 %v2197_v18  ;;  %1820 = vmatprep.subr.bf16.mxu1 %v2199_v19 }
 0x149   :  { %557 = vmatprep.mubr.f32.mxu0 %v2128_v8  ;;  %628 = vmatprep.mubr.f32.mxu1 %v2128_v8 }
 0x14b   :  { %1806 = vmatpush1.bf16.msra.mxu0 %v2202_v23  ;;  %1822 = vmatpush1.bf16.msra.mxu1 %v2206_v27 }
 0x14c   :  { %1808 = vmatprep.subr.bf16.mxu0 %v2208_v28  ;;  %1824 = vmatprep.subr.bf16.mxu1 %v2210_v32 }
 0x14f   :  { %1810 = vmatpush1.bf16.msra.mxu0 %v2213_v36  ;;  %1826 = vmatpush1.bf16.msra.mxu1 %v2217_v40 }
 0x150   :  { %1812 = vmatprep.subr.bf16.mxu0 %v2219_v41  ;;  %1828 = vmatprep.subr.bf16.mxu1 %v2222_v45 }
 0x153   :  { %1814 = vmatpush1.bf16.msra.mxu0 %v2225_v48  ;;  %1830 = vmatpush1.bf16.msra.mxu1 %v2229_v49 }
 0x154   :  { %1832 = vmatprep.subr.bf16.mxu0 %v2184_v4  ;;  %1848 = vmatprep.subr.bf16.mxu1 %v2188_v9 }
 0x219   :  { %v360_v33 = vpop.f32.mrb[2].mxu0  ;;  %v431_v34 = vpop.f32.mrb[2].mxu1 }
 0x21a   :  { %v362_v35 = vpop.f32.mrb[3].mxu0  ;;  %v433_v37 = vpop.f32.mrb[3].mxu1 }
 0x21b   :  { %v440_v38 = vcombine.low %v360_v33, %v362_v35  ;;  %v441_v42 = vcombine.low %v431_v34, %v433_v37 }
 0x21d   :  { %v448_v43 = vrot.slane %v440_v38, %v2256_v56  ;;  %v455_v44 = vrot.slane %v441_v42, %v2256_v56 }
 0x21f   :  { %v456_v47 = vcombine.low %v448_v43, %v455_v44 }
 0x221   :  { %v463_v50 = vrot.slane %v456_v47, %v2256_v56 }
 0x223   :  { %v465_v51 = vadd.f32 %v463_v50, %v290_v46  ;;  %v686_v46 = vstv %s1715_s20 }
 0x225   :  { %v1710_v52 = vmul.f32 -1.442695, %v465_v51  ;;  %v473_v55 = vrot.slane %v465_v51, 3 }
 0x227   :  { %2006 = vpow2.f32 %v1710_v52 }
 0x231   :  { %v2007_v53 = vpop.eup %2006 }
 0x232   :  { %v469_v54 = vadd.f32 1.0, %v2007_v53 }
 0x234   :  { %2008 = vrcp.f32 %v469_v54  ;;  %v687_v54 = vmul.f32 %v686_v46, %v2261_v57 }
 0x235   :  { %2010 = vtanh.f32 %v473_v55 }
 0x23e   :  { %v2009_v58 = vpop.eup %2008 }
 0x23f   :  { %v477_v59 = vrot.slane %v2009_v58, 1  ;;  %v2011_v60 = vpop.eup %2010  ;;  %v483_v0 = vrot.slane %v2009_v58, 2 }
 0x240   :  { %v480_v62 = vmul.f32 %v2011_v60, %v2009_v58  ;;  %v688_v60 = vadd.f32 %v687_v54, %v2268_v2 }
 0x241   :  { %v479_v61 = vmul.f32 %v477_v59, %v282_v25 }
 0x243   :  { %v481_v63 = vadd.f32 %v480_v62, %v479_v61 }
 0x245   :  { %2012 = vtanh.f32 %v481_v63 }
 0x24f   :  { %v2013_v1 = vpop.eup %2012 }
 0x250   :  { %v485_v3 = vmul.f32 %v2013_v1, %v483_v0 }
 0x252   :  { %1712 = vmatmul.mubr.msk.f32.vlgmr.msra.gmra.mrb[4].mxu0 %vm91_vm0, %v485_v3  ;;  %1713 = vmatmul.mubr.msk.f32.vlgmr.msra.gmra.mrb[4].mxu1 %vm91_vm0, %v485_v3 }
 0x253   :  { %1834 = vmatpush1.bf16.msra.mxu0 %v2190_v10  ;;  %1850 = vmatpush1.bf16.msra.mxu1 %v2193_v14 }
 0x254   :  { %1836 = vmatprep.subr.bf16.mxu0 %v2197_v18  ;;  %1852 = vmatprep.subr.bf16.mxu1 %v2199_v19 }
 0x255   :  { %756 = vmatprep.mubr.f32.mxu0 %v2128_v8  ;;  %827 = vmatprep.mubr.f32.mxu1 %v2128_v8 }
 0x257   :  { %1838 = vmatpush1.bf16.msra.mxu0 %v2202_v23  ;;  %1854 = vmatpush1.bf16.msra.mxu1 %v2206_v27 }
 0x258   :  { %1840 = vmatprep.subr.bf16.mxu0 %v2208_v28  ;;  %1856 = vmatprep.subr.bf16.mxu1 %v2210_v32 }
 0x25b   :  { %1842 = vmatpush1.bf16.msra.mxu0 %v2213_v36  ;;  %1858 = vmatpush1.bf16.msra.mxu1 %v2217_v40 }
 0x25c   :  { %1844 = vmatprep.subr.bf16.mxu0 %v2219_v41  ;;  %1860 = vmatprep.subr.bf16.mxu1 %v2222_v45 }
 0x25f   :  { %1846 = vmatpush1.bf16.msra.mxu0 %v2225_v48  ;;  %1862 = vmatpush1.bf16.msra.mxu1 %v2229_v49 }
 0x260   :  { %1864 = vmatprep.subr.bf16.mxu0 %v2184_v4  ;;  %1880 = vmatprep.subr.bf16.mxu1 %v2188_v9 }
 0x325   :  { %v559_v6 = vpop.f32.mrb[4].mxu0  ;;  %v630_v7 = vpop.f32.mrb[4].mxu1 }
 0x326   :  { %v561_v11 = vpop.f32.mrb[5].mxu0  ;;  %v632_v12 = vpop.f32.mrb[5].mxu1 }
 0x327   :  { %v639_v13 = vcombine.low %v559_v6, %v561_v11  ;;  %v640_v16 = vcombine.low %v630_v7, %v632_v12 }
 0x329   :  { %v647_v17 = vrot.slane %v639_v13, %v2256_v56  ;;  %v654_v20 = vrot.slane %v640_v16, %v2256_v56 }
 0x32b   :  { %v655_v22 = vcombine.low %v647_v17, %v654_v20 }
 0x32d   :  { %v662_v24 = vrot.slane %v655_v22, %v2256_v56 }
 0x32f   :  { %v664_v25 = vadd.f32 %v662_v24, %v489_v21  ;;  %v885_v21 = vstv %s1719_s21 }
 0x331   :  { %v1714_v26 = vmul.f32 -1.442695, %v664_v25  ;;  %v672_v31 = vrot.slane %v664_v25, 3 }
 0x333   :  { %2014 = vpow2.f32 %v1714_v26 }
 0x33d   :  { %v2015_v29 = vpop.eup %2014 }
 0x33e   :  { %v668_v30 = vadd.f32 1.0, %v2015_v29 }
 0x340   :  { %2016 = vrcp.f32 %v668_v30  ;;  %v886_v30 = vmul.f32 %v885_v21, %v2261_v57 }
 0x341   :  { %2018 = vtanh.f32 %v672_v31 }
 0x34a   :  { %v2017_v33 = vpop.eup %2016 }
 0x34b   :  { %v676_v34 = vrot.slane %v2017_v33, 1  ;;  %v2019_v35 = vpop.eup %2018  ;;  %v682_v42 = vrot.slane %v2017_v33, 2 }
 0x34c   :  { %v679_v38 = vmul.f32 %v2019_v35, %v2017_v33  ;;  %v887_v35 = vadd.f32 %v886_v30, %v2268_v2 }
 0x34d   :  { %v678_v37 = vmul.f32 %v676_v34, %v481_v63 }
 0x34f   :  { %v680_v39 = vadd.f32 %v679_v38, %v678_v37 }
 0x351   :  { %2020 = vtanh.f32 %v680_v39 }
 0x35b   :  { %v2021_v43 = vpop.eup %2020 }
 0x35c   :  { %v684_v44 = vmul.f32 %v2021_v43, %v682_v42 }
 0x35e   :  { %1716 = vmatmul.mubr.msk.f32.vlgmr.msra.gmra.mrb[6].mxu0 %vm91_vm0, %v684_v44  ;;  %1717 = vmatmul.mubr.msk.f32.vlgmr.msra.gmra.mrb[6].mxu1 %vm91_vm0, %v684_v44 }
 0x35f   :  { %1866 = vmatpush1.bf16.msra.mxu0 %v2190_v10  ;;  %1882 = vmatpush1.bf16.msra.mxu1 %v2193_v14 }
 0x360   :  { %1868 = vmatprep.subr.bf16.mxu0 %v2197_v18  ;;  %1884 = vmatprep.subr.bf16.mxu1 %v2199_v19 }
 0x361   :  { %955 = vmatprep.mubr.f32.mxu0 %v2128_v8  ;;  %1026 = vmatprep.mubr.f32.mxu1 %v2128_v8 }
 0x363   :  { %1870 = vmatpush1.bf16.msra.mxu0 %v2202_v23  ;;  %1886 = vmatpush1.bf16.msra.mxu1 %v2206_v27 }
 0x364   :  { %1872 = vmatprep.subr.bf16.mxu0 %v2208_v28  ;;  %1888 = vmatprep.subr.bf16.mxu1 %v2210_v32 }
 0x367   :  { %1874 = vmatpush1.bf16.msra.mxu0 %v2213_v36  ;;  %1890 = vmatpush1.bf16.msra.mxu1 %v2217_v40 }
 0x368   :  { %1876 = vmatprep.subr.bf16.mxu0 %v2219_v41  ;;  %1892 = vmatprep.subr.bf16.mxu1 %v2222_v45 }
 0x36b   :  { %1878 = vmatpush1.bf16.msra.mxu0 %v2225_v48  ;;  %1894 = vmatpush1.bf16.msra.mxu1 %v2229_v49 }
 0x36c   :  { %1896 = vmatprep.subr.bf16.mxu0 %v2184_v4  ;;  %1912 = vmatprep.subr.bf16.mxu1 %v2188_v9 }
 0x431   :  { %v758_v47 = vpop.f32.mrb[6].mxu0  ;;  %v829_v50 = vpop.f32.mrb[6].mxu1 }
 0x432   :  { %v760_v51 = vpop.f32.mrb[7].mxu0  ;;  %v831_v52 = vpop.f32.mrb[7].mxu1 }
 0x433   :  { %v838_v53 = vcombine.low %v758_v47, %v760_v51  ;;  %v839_v55 = vcombine.low %v829_v50, %v831_v52 }
 0x435   :  { %v846_v58 = vrot.slane %v838_v53, %v2256_v56  ;;  %v853_v59 = vrot.slane %v839_v55, %v2256_v56 }
 0x437   :  { %v854_v61 = vcombine.low %v846_v58, %v853_v59 }
 0x439   :  { %v861_v62 = vrot.slane %v854_v61, %v2256_v56 }
 0x43b   :  { %v863_v63 = vadd.f32 %v861_v62, %v688_v60  ;;  %v1084_v60 = vstv %s1723_s22 }
 0x43d   :  { %v1718_v0 = vmul.f32 -1.442695, %v863_v63  ;;  %v871_v5 = vrot.slane %v863_v63, 3 }
 0x43f   :  { %2022 = vpow2.f32 %v1718_v0 }
 0x449   :  { %v2023_v1 = vpop.eup %2022 }
 0x44a   :  { %v867_v3 = vadd.f32 1.0, %v2023_v1 }
 0x44c   :  { %2024 = vrcp.f32 %v867_v3  ;;  %v1085_v3 = vmul.f32 %v1084_v60, %v2261_v57 }
 0x44d   :  { %2026 = vtanh.f32 %v871_v5 }
 0x456   :  { %v2025_v6 = vpop.eup %2024 }
 0x457   :  { %v875_v7 = vrot.slane %v2025_v6, 1  ;;  %v2027_v11 = vpop.eup %2026  ;;  %v881_v16 = vrot.slane %v2025_v6, 2 }
 0x458   :  { %v878_v13 = vmul.f32 %v2027_v11, %v2025_v6  ;;  %v1086_v11 = vadd.f32 %v1085_v3, %v2268_v2 }
 0x459   :  { %v877_v12 = vmul.f32 %v875_v7, %v680_v39 }
 0x45b   :  { %v879_v15 = vadd.f32 %v878_v13, %v877_v12 }
 0x45d   :  { %2028 = vtanh.f32 %v879_v15 }
 0x467   :  { %v2029_v17 = vpop.eup %2028 }
 0x468   :  { %v883_v20 = vmul.f32 %v2029_v17, %v881_v16 }
 0x46a   :  { %1720 = vmatmul.mubr.msk.f32.vlgmr.msra.gmra.mrb[8].mxu0 %vm91_vm0, %v883_v20  ;;  %1721 = vmatmul.mubr.msk.f32.vlgmr.msra.gmra.mrb[8].mxu1 %vm91_vm0, %v883_v20 }
 0x46b   :  { %1898 = vmatpush1.bf16.msra.mxu0 %v2190_v10  ;;  %1914 = vmatpush1.bf16.msra.mxu1 %v2193_v14 }
 0x46c   :  { %1900 = vmatprep.subr.bf16.mxu0 %v2197_v18  ;;  %1916 = vmatprep.subr.bf16.mxu1 %v2199_v19 }
 0x46d   :  { %1154 = vmatprep.mubr.f32.mxu0 %v2128_v8  ;;  %1225 = vmatprep.mubr.f32.mxu1 %v2128_v8 }
 0x46f   :  { %1902 = vmatpush1.bf16.msra.mxu0 %v2202_v23  ;;  %1918 = vmatpush1.bf16.msra.mxu1 %v2206_v27 }
 0x470   :  { %1904 = vmatprep.subr.bf16.mxu0 %v2208_v28  ;;  %1920 = vmatprep.subr.bf16.mxu1 %v2210_v32 }
 0x473   :  { %1906 = vmatpush1.bf16.msra.mxu0 %v2213_v36  ;;  %1922 = vmatpush1.bf16.msra.mxu1 %v2217_v40 }
 0x474   :  { %1908 = vmatprep.subr.bf16.mxu0 %v2219_v41  ;;  %1924 = vmatprep.subr.bf16.mxu1 %v2222_v45 }
 0x477   :  { %1910 = vmatpush1.bf16.msra.mxu0 %v2225_v48  ;;  %1926 = vmatpush1.bf16.msra.mxu1 %v2229_v49 }
 0x478   :  { %1928 = vmatprep.subr.bf16.mxu0 %v2184_v4  ;;  %1944 = vmatprep.subr.bf16.mxu1 %v2188_v9 }
 0x53d   :  { %v957_v22 = vpop.f32.mrb[8].mxu0  ;;  %v1028_v24 = vpop.f32.mrb[8].mxu1 }
 0x53e   :  { %v959_v25 = vpop.f32.mrb[9].mxu0  ;;  %v1030_v26 = vpop.f32.mrb[9].mxu1 }
 0x53f   :  { %v1037_v29 = vcombine.low %v957_v22, %v959_v25  ;;  %v1038_v31 = vcombine.low %v1028_v24, %v1030_v26 }
 0x541   :  { %v1045_v33 = vrot.slane %v1037_v29, %v2256_v56  ;;  %v1052_v34 = vrot.slane %v1038_v31, %v2256_v56 }
 0x543   :  { %v1053_v37 = vcombine.low %v1045_v33, %v1052_v34 }
 0x545   :  { %v1060_v38 = vrot.slane %v1053_v37, %v2256_v56 }
 0x547   :  { %v1062_v39 = vadd.f32 %v1060_v38, %v887_v35 }
 0x549   :  { %v1722_v42 = vmul.f32 -1.442695, %v1062_v39  ;;  %v1070_v46 = vrot.slane %v1062_v39, 3 }
 0x54b   :  { %2030 = vpow2.f32 %v1722_v42 }
 0x555   :  { %v2031_v43 = vpop.eup %2030 }
 0x556   :  { %v1066_v44 = vadd.f32 1.0, %v2031_v43 }
 0x558   :  { %2032 = vrcp.f32 %v1066_v44 }
 0x559   :  { %2034 = vtanh.f32 %v1070_v46 }
 0x562   :  { %v2033_v47 = vpop.eup %2032 }
 0x563   :  { %v1074_v50 = vrot.slane %v2033_v47, 1  ;;  %v2035_v51 = vpop.eup %2034  ;;  %v1080_v55 = vrot.slane %v2033_v47, 2 }
 0x564   :  { %v1077_v53 = vmul.f32 %v2035_v51, %v2033_v47  ;;  %v1482_v51 = vstv %s1731_s24 }
 0x565   :  { %v1076_v52 = vmul.f32 %v1074_v50, %v879_v15 }
 0x567   :  { %v1078_v54 = vadd.f32 %v1077_v53, %v1076_v52 }
 0x569   :  { %2036 = vtanh.f32 %v1078_v54 }
 0x573   :  { %v2037_v58 = vpop.eup %2036 }
 0x574   :  { %v1082_v59 = vmul.f32 %v2037_v58, %v1080_v55 }
 0x576   :  { %1724 = vmatmul.mubr.msk.f32.vlgmr.msra.gmra.mrb[10].mxu0 %vm91_vm0, %v1082_v59  ;;  %1725 = vmatmul.mubr.msk.f32.vlgmr.msra.gmra.mrb[10].mxu1 %vm91_vm0, %v1082_v59  ;;  %v1483_v59 = vmul.f32 %v1482_v51, %v2261_v57 }
 0x577   :  { %1930 = vmatpush1.bf16.msra.mxu0 %v2190_v10  ;;  %1946 = vmatpush1.bf16.msra.mxu1 %v2193_v14 }
 0x578   :  { %1932 = vmatprep.subr.bf16.mxu0 %v2197_v18  ;;  %1948 = vmatprep.subr.bf16.mxu1 %v2199_v19 }
 0x579   :  { %1353 = vmatprep.mubr.f32.mxu0 %v2128_v8  ;;  %1424 = vmatprep.mubr.f32.mxu1 %v2128_v8 }
 0x57b   :  { %1934 = vmatpush1.bf16.msra.mxu0 %v2202_v23  ;;  %1950 = vmatpush1.bf16.msra.mxu1 %v2206_v27 }
 0x57c   :  { %1936 = vmatprep.subr.bf16.mxu0 %v2208_v28  ;;  %1952 = vmatprep.subr.bf16.mxu1 %v2210_v32 }
 0x57f   :  { %1938 = vmatpush1.bf16.msra.mxu0 %v2213_v36  ;;  %1954 = vmatpush1.bf16.msra.mxu1 %v2217_v40 }
 0x580   :  { %1940 = vmatprep.subr.bf16.mxu0 %v2219_v41  ;;  %1956 = vmatprep.subr.bf16.mxu1 %v2222_v45 }
 0x583   :  { %1942 = vmatpush1.bf16.msra.mxu0 %v2225_v48  ;;  %1958 = vmatpush1.bf16.msra.mxu1 %v2229_v49 }
 0x584   :  { %1960 = vmatprep.subr.bf16.mxu0 %v2184_v4  ;;  %1976 = vmatprep.subr.bf16.mxu1 %v2188_v9 }
 0x649   :  { %v1156_v61 = vpop.f32.mrb[10].mxu0  ;;  %v1227_v62 = vpop.f32.mrb[10].mxu1 }
 0x64a   :  { %v1158_v63 = vpop.f32.mrb[11].mxu0  ;;  %v1229_v0 = vpop.f32.mrb[11].mxu1 }
 0x64b   :  { %v1236_v1 = vcombine.low %v1156_v61, %v1158_v63  ;;  %v1237_v5 = vcombine.low %v1227_v62, %v1229_v0  ;;  %v1484_v63 = vadd.f32 %v1483_v59, %v2268_v2 }
 0x64d   :  { %v1244_v6 = vrot.slane %v1236_v1, %v2256_v56  ;;  %v1251_v7 = vrot.slane %v1237_v5, %v2256_v56 }
 0x64f   :  { %v1252_v12 = vcombine.low %v1244_v6, %v1251_v7 }
 0x651   :  { %v1259_v4 = vrot.slane %v1252_v12, %v2256_v56 }
 0x653   :  { %v1261_v9 = vadd.f32 %v1259_v4, %v1086_v11 }
 0x655   :  { %v1726_v13 = vmul.f32 -1.442695, %v1261_v9  ;;  %v1269_v17 = vrot.slane %v1261_v9, 3 }
 0x657   :  { %2038 = vpow2.f32 %v1726_v13 }
 0x661   :  { %v2039_v15 = vpop.eup %2038 }
 0x662   :  { %v1265_v16 = vadd.f32 1.0, %v2039_v15 }
 0x664   :  { %2040 = vrcp.f32 %v1265_v16 }
 0x665   :  { %2042 = vtanh.f32 %v1269_v17 }
 0x66e   :  { %v2041_v20 = vpop.eup %2040 }
 0x66f   :  { %v1273_v21 = vrot.slane %v2041_v20, 1  ;;  %v2043_v22 = vpop.eup %2042  ;;  %v1279_v29 = vrot.slane %v2041_v20, 2 }
 0x670   :  { %v1276_v25 = vmul.f32 %v2043_v22, %v2041_v20  ;;  %v1686_v22 = vld [vmem:[#allocation2] sm:$0x1] }
 0x671   :  { %v1275_v24 = vmul.f32 %v1273_v21, %v1078_v54 }
 0x673   :  { %v1277_v26 = vadd.f32 %v1276_v25, %v1275_v24 }
 0x675   :  { %2044 = vtanh.f32 %v1277_v26 }
 0x67f   :  { %v2045_v30 = vpop.eup %2044 }
 0x680   :  { %v1281_v31 = vmul.f32 %v2045_v30, %v1279_v29 }
 0x682   :  { %1728 = vmatmul.mubr.msk.f32.vlgmr.msra.gmra.mrb[12].mxu0 %vm91_vm0, %v1281_v31  ;;  %1729 = vmatmul.mubr.msk.f32.vlgmr.msra.gmra.mrb[12].mxu1 %vm91_vm0, %v1281_v31 }
 0x683   :  { %1962 = vmatpush1.bf16.msra.mxu0 %v2190_v10  ;;  %1978 = vmatpush1.bf16.msra.mxu1 %v2193_v14 }
 0x684   :  { %1964 = vmatprep.subr.bf16.mxu0 %v2197_v18  ;;  %1980 = vmatprep.subr.bf16.mxu1 %v2199_v19 }
 0x685   :  { %1552 = vmatprep.mubr.f32.mxu0 %v2128_v8  ;;  %1623 = vmatprep.mubr.f32.mxu1 %v2128_v8  ;;  %v1283_v8 = vstv %s1727_s23 }
 0x687   :  { %1966 = vmatpush1.bf16.msra.mxu0 %v2202_v23  ;;  %1982 = vmatpush1.bf16.msra.mxu1 %v2206_v27  ;;  %v1284_v27 = vmul.f32 %v1283_v8, %v2261_v57 }
 0x688   :  { %1968 = vmatprep.subr.bf16.mxu0 %v2208_v28  ;;  %1984 = vmatprep.subr.bf16.mxu1 %v2210_v32 }
 0x68b   :  { %1970 = vmatpush1.bf16.msra.mxu0 %v2213_v36  ;;  %1986 = vmatpush1.bf16.msra.mxu1 %v2217_v40  ;;  %v1285_v40 = vadd.f32 %v1284_v27, %v2268_v2 }
 0x68c   :  { %1972 = vmatprep.subr.bf16.mxu0 %v2219_v41  ;;  %1988 = vmatprep.subr.bf16.mxu1 %v2222_v45 }
 0x68f   :  { %1974 = vmatpush1.bf16.msra.mxu0 %v2225_v48  ;;  %1990 = vmatpush1.bf16.msra.mxu1 %v2229_v49 }
 0x755   :  { %v1355_v10 = vpop.f32.mrb[12].mxu0  ;;  %v1426_v14 = vpop.f32.mrb[12].mxu1 }
 0x756   :  { %v1357_v18 = vpop.f32.mrb[13].mxu0  ;;  %v1428_v19 = vpop.f32.mrb[13].mxu1 }
 0x757   :  { %v1435_v23 = vcombine.low %v1355_v10, %v1357_v18  ;;  %v1436_v28 = vcombine.low %v1426_v14, %v1428_v19 }
 0x759   :  { %v1443_v32 = vrot.slane %v1435_v23, %v2256_v56  ;;  %v1450_v36 = vrot.slane %v1436_v28, %v2256_v56 }
 0x75b   :  { %v1451_v41 = vcombine.low %v1443_v32, %v1450_v36 }
 0x75d   :  { %v1458_v45 = vrot.slane %v1451_v41, %v2256_v56 }
 0x75f   :  { %v1460_v48 = vadd.f32 %v1458_v45, %v1285_v40 }
 0x761   :  { %v1730_v49 = vmul.f32 -1.442695, %v1460_v48  ;;  %v1468_v35 = vrot.slane %v1460_v48, 3 }
 0x763   :  { %2046 = vpow2.f32 %v1730_v49 }
 0x76d   :  { %v2047_v33 = vpop.eup %2046 }
 0x76e   :  { %v1464_v34 = vadd.f32 1.0, %v2047_v33 }
 0x770   :  { %2048 = vrcp.f32 %v1464_v34 }
 0x771   :  { %2050 = vtanh.f32 %v1468_v35 }
 0x77a   :  { %v2049_v37 = vpop.eup %2048 }
 0x77b   :  { %v1472_v38 = vrot.slane %v2049_v37, 1  ;;  %v2051_v39 = vpop.eup %2050  ;;  %v1478_v46 = vrot.slane %v2049_v37, 2 }
 0x77c   :  { %v1475_v43 = vmul.f32 %v2051_v39, %v2049_v37 }
 0x77d   :  { %v1474_v42 = vmul.f32 %v1472_v38, %v1277_v26 }
 0x77f   :  { %v1476_v44 = vadd.f32 %v1475_v43, %v1474_v42 }
 0x781   :  { %2052 = vtanh.f32 %v1476_v44 }
 0x78b   :  { %v2053_v47 = vpop.eup %2052 }
 0x78c   :  { %v1480_v50 = vmul.f32 %v2053_v47, %v1478_v46 }
 0x78e   :  { %1732 = vmatmul.mubr.msk.f32.vlgmr.msra.gmra.mrb[14].mxu0 %vm91_vm0, %v1480_v50  ;;  %1733 = vmatmul.mubr.msk.f32.vlgmr.msra.gmra.mrb[14].mxu1 %vm91_vm0, %v1480_v50 }
 0x861   :  { %v1554_v52 = vpop.f32.mrb[14].mxu0  ;;  %v1625_v53 = vpop.f32.mrb[14].mxu1 }
 0x862   :  { %v1556_v54 = vpop.f32.mrb[15].mxu0  ;;  %v1627_v55 = vpop.f32.mrb[15].mxu1 }
 0x863   :  { %v1634_v58 = vcombine.low %v1554_v52, %v1556_v54  ;;  %v1635_v60 = vcombine.low %v1625_v53, %v1627_v55 }
 0x865   :  { %v1642_v61 = vrot.slane %v1634_v58, %v2256_v56  ;;  %v1649_v62 = vrot.slane %v1635_v60, %v2256_v56 }
 0x867   :  { %v1650_v0 = vcombine.low %v1642_v61, %v1649_v62 }
 0x869   :  { %v1657_v1 = vrot.slane %v1650_v0, %v2256_v56  ;;  %v1680_v56 = vld [vmem:[%s2447_s4] sm:$0x1] }
 0x86b   :  { %v1659_v3 = vadd.f32 %v1657_v1, %v1484_v63 }
 0x86d   :  { %v1734_v5 = vmul.f32 -1.442695, %v1659_v3  ;;  %v1667_v11 = vrot.slane %v1659_v3, 3 }
 0x86f   :  { %2054 = vpow2.f32 %v1734_v5 }
 0x879   :  { %v2055_v6 = vpop.eup %2054 }
 0x87a   :  { %v1663_v7 = vadd.f32 1.0, %v2055_v6 }
 0x87c   :  { %2056 = vrcp.f32 %v1663_v7 }
 0x87d   :  { %2058 = vtanh.f32 %v1667_v11 }
 0x886   :  { %v2057_v12 = vpop.eup %2056 }
 0x887   :  { %v1671_v57 = vrot.slane %v2057_v12, 1  ;;  %v2059_v4 = vpop.eup %2058  ;;  %v1677_v16 = vrot.slane %v2057_v12, 2 }
 0x888   :  { %v1674_v13 = vmul.f32 %v2059_v4, %v2057_v12 }
 0x889   :  { %v1673_v9 = vmul.f32 %v1671_v57, %v1476_v44 }
 0x88b   :  { %v1675_v15 = vadd.f32 %v1674_v13, %v1673_v9 }
 0x88d   :  { %2060 = vtanh.f32 %v1675_v15 }
 0x897   :  { %v2061_v2 = vpop.eup %2060 }
 0x898   :  { %v1679_v17 = vmul.f32 %v2061_v2, %v1677_v16 }
 0x89a   :  { %v1681_v20 = vmul.f32 %v1680_v56, %v1679_v17 }
 0x89c   :  { %v1683_v21 = vsel %vm1682_vm1, %v1681_v20, 0.0 }
 0x89d   :  { %1684 = vadd.xlane.f32.xlu0 %v1683_v21 }
 0x92a   :  { %v1685_v24 = vpop.xlane.xlu0 %1684 }
 0x92b   :  { %v1687_v25 = vadd.f32 %v1686_v22, %v1685_v24 }
 0x92d   :  { %1689 = vst.msk [vmem:[#allocation8] sm:$0x1] %vm1688_vm2, %v1687_v25 }
 0x92e   :  { %2107 = shalt.err (!%p2104_p3)
}
 0x92f   :  { %s2108_s7 = scalar_lea.hbm %s2449_s6, 16 }
 0x930   :  { %p2109_p4 = scmp.ne.s32.totalorder %s2449_s6, %s2108_s7  ;;  %p2112_p5 = scmp.lt.u32.totalorder %s2108_s7, %s2449_s6 }
 0x932   :  { %p2114_p6 = pnand %p2112_p5, %p2109_p4 }
 0x934   :  { %2117 = shalt.err (!%p2114_p6)
}
 0x935   :  { %1699 = dma.vmem_to_hbm [thread:$0]  %s1697_s28, 16, %s2449_s6, [#allocation5]  }
 0x936   :  { %2122 = dma.done.wait [#allocation5], 16  }
 0x937   :  { %2123 = vsyncadd [#allocation5], 4294967280 }
 0x938   :  { %1703 = vsyncpa [#allocation4], 1 }
 0x939   :  { %1704 = vsyncpa [#allocation5], 1 }
 0x93a   :  { %1705 = vsyncpa [#allocation6], 1 }

</bundles_post_ra>
